<compile_context>
chip_gen: v7x
topology: tpu7x:2x2x1
jax: 0.10.0
libtpu: 0.0.40
codegen_flags: <defaults>
</compile_context>

<pallas_src>
import functools
from dataclasses import dataclass

import jax
import jax.numpy as jnp
from jax import lax
from jax.experimental import pallas as pl
from jax.experimental.pallas import tpu as pltpu


# ----------------------------------------------------------------------------
# Fused weighted cross-entropy kernel
# ----------------------------------------------------------------------------
_NEG = -1e30                       # in-kernel mask value for invalid class rows
_LANES = 128
_SUBLANES = 8
_PIPELINE_VMEM_BUDGET = 8 << 20    # double-buffered input footprint target (bytes)


def _round_up(v, m):
    return -(-v // m) * m


def _fused_ce_kernel(logits_ref, meta_ref, effw_ref, out_ref, *, class_counts,
                     out_rows):
    num_tasks = len(class_counts)
    x = logits_ref[...].astype(jnp.float32)          # (cpad, T) cast on load (bf16 ok)
    labels = meta_ref[0:1, :]                        # (1, T) int32
    task = meta_ref[1:2, :]                          # (1, T) int32 (-1 for padding)
    effw = effw_ref[...]                             # (1, T) f32 (0 => ignored/pad)

    cpad, t = x.shape
    row = lax.broadcasted_iota(jnp.int32, (cpad, t), 0)

    # Per-example class count from the static per-task counts; mask the pad class
    # rows in-kernel (more robust than a magic sentinel pre-pad in the wrapper).
    c_col = jnp.full((1, t), class_counts[-1], jnp.int32)
    for tid in range(num_tasks - 1):
        c_col = jnp.where(task == tid, class_counts[tid], c_col)
    xm = jnp.where(row < c_col, x, _NEG)

    # numerically stable log-sum-exp over the class (sublane) axis
    m = jnp.max(xm, axis=0, keepdims=True)                                # (1, T)
    lse = m + jnp.log(jnp.sum(jnp.exp(xm - m), axis=0, keepdims=True))    # (1, T)

    # pick x[label] via a masked sublane reduce (no (C,N) one-hot temporaries kept)
    picked = jnp.sum(jnp.where(row == labels, xm, 0.0), axis=0, keepdims=True)

    valid = effw > 0.0
    wnll = jnp.where(valid, effw * (lse - picked), 0.0)                   # (1, T)

    # lane-fold (1, T) -> (1, 128): static 128-aligned slices, pure VPU adds.
    def lane_fold(v):
        acc = v[:, 0:_LANES]
        for k in range(1, t // _LANES):
            acc = acc + v[:, k * _LANES:(k + 1) * _LANES]
        return acc

    rows = []
    for tid in range(num_tasks):                     # statically unrolled (<=3 tasks)
        sel = task == tid
        rows.append(lane_fold(jnp.where(sel, wnll, 0.0)))
        rows.append(lane_fold(jnp.where(sel, effw, 0.0)))
    zero = jnp.zeros((1, _LANES), jnp.float32)
    rows.extend([zero] * (out_rows - len(rows)))
    out_ref[...] = jnp.concatenate(rows, axis=0)     # single lane-dense 8x128 store


def _ce_task(logits, labels, weight, ignore_index):
    """Prepare one CE sub-problem for the fused kernel.

    Returns (logits_T [C, N] in native dtype, labels [N] int32,
    effective per-example weight [N] f32 = weight[label] for valid rows else 0).
    """
    n, c = logits.shape
    labels = labels.astype(jnp.int32).reshape(n)
    weight = weight.astype(jnp.float32).reshape(c)
    valid = (labels != ignore_index) & (labels >= 0) & (labels < c)
    effw = jnp.where(valid, jnp.take(weight, jnp.clip(labels, 0, c - 1)), 0.0)
    return logits.T, labels, effw


def fused_weighted_ce_sums(tasks, vmem_pipeline_budget=_PIPELINE_VMEM_BUDGET):
    """Single pallas_call over several CE heads.

    tasks: list of (logits_T [C_k, N_k], labels [N_k], effw [N_k]).
    Returns f32 [num_tasks, 2] with (sum_i w[y_i]*nll_i, sum_i w[y_i]) over the
    non-ignored rows of each task — PyTorch's weighted-'mean' numerator/denominator.
    """
    num_tasks = len(tasks)
    assert 1 <= num_tasks <= 4
    dt = jnp.result_type(*[t[0].dtype for t in tasks])
    itemsize = jnp.dtype(dt).itemsize
    sub_pack = {4: 8, 2: 16, 1: 32}.get(itemsize, 8)      # dtype-aware sublane packing
    class_counts = tuple(int(t[0].shape[0]) for t in tasks)
    cpad = _round_up(max(class_counts), sub_pack)
    ntot = sum(int(t[0].shape[1]) for t in tasks)
    n128 = _round_up(ntot, _LANES)

    # --- lane tile from a VMEM budget safe on v5e/v6e/v7x, capped at 2048 lanes.
    bytes_per_lane = cpad * itemsize + 2 * 4 + 4          # logits + meta(2xi32) + effw
    max_tile = (vmem_pipeline_budget // (2 * bytes_per_lane)) // _LANES * _LANES
    tile = max(_LANES, min(2048, max_tile, n128))
    if tile >= n128 and n128 >= 2 * _LANES:
        # keep >= 2 grid blocks so the "parallel" axis can shard over v7x's 2 TCs
        tile = _round_up(n128 // 2, _LANES)
    nblocks = -(-n128 // tile)
    npad = nblocks * tile

    logit_parts, label_parts, task_parts, effw_parts = [], [], [], []
    for tid, (lgt, lab, ew) in enumerate(tasks):
        c, n = lgt.shape
        # zero-pad the class rows; the kernel masks them with `row < c_task`
        logit_parts.append(jnp.pad(lgt.astype(dt), ((0, cpad - c), (0, 0))))
        label_parts.append(lab.astype(jnp.int32))
        task_parts.append(jnp.full((n,), tid, jnp.int32))
        effw_parts.append(ew.astype(jnp.float32))

    lane_pad = npad - ntot
    big_logits = jnp.pad(jnp.concatenate(logit_parts, axis=1),
                         ((0, 0), (0, lane_pad)))
    meta = jnp.stack([
        jnp.pad(jnp.concatenate(label_parts), (0, lane_pad), constant_values=0),
        jnp.pad(jnp.concatenate(task_parts), (0, lane_pad), constant_values=-1),
    ], axis=0)                                             # (2, npad) int32
    effw = jnp.pad(jnp.concatenate(effw_parts), (0, lane_pad),
                   constant_values=0.0).reshape(1, npad)

    out_rows = _SUBLANES                                   # 8 >= 2*num_tasks
    kernel = functools.partial(_fused_ce_kernel, class_counts=class_counts,
                               out_rows=out_rows)
    partials = pl.pallas_call(
        kernel,
        grid=(nblocks,),
        in_specs=[
            pl.BlockSpec((cpad, tile), lambda i: (0, i)),
            pl.BlockSpec((2, tile), lambda i: (0, i)),
            pl.BlockSpec((1, tile), lambda i: (0, i)),
        ],
        out_specs=pl.BlockSpec((out_rows, _LANES), lambda i: (i, 0)),
        out_shape=jax.ShapeDtypeStruct((nblocks * out_rows, _LANES), jnp.float32),
        compiler_params=pltpu.CompilerParams(
            dimension_semantics=("parallel",),             # disjoint per-block output
            vmem_limit_bytes=32 << 20),
    )(big_logits, meta, effw)

    # finish the tiny block/lane reduction in XLA glue
    sums = jnp.sum(partials.reshape(nblocks, out_rows, _LANES), axis=(0, 2))   # (8,)
    return sums[: 2 * num_tasks].reshape(num_tasks, 2)


# ----------------------------------------------------------------------------
# Module-level glue (config, matcher, SetCriterion)
# ----------------------------------------------------------------------------
@dataclass
class Config:
    event_type_classes: int = 4
    event_type_weight: tuple = None       # falsy -> ones with na_coef on last class
    neg_field_loss_scaling: float = 3.0
    use_context_consistency: bool = True


def identity_matcher(outputs, targets, event_mask_tensor):
    # TODO(synk): the Hungarian / set matcher is an external module; a deterministic
    # identity matching (gold i <-> pred-set i) is used here in its place.
    num_gold = targets["doc_event_label"].shape[0]
    idx = jnp.arange(num_gold, dtype=jnp.int32)
    return (idx, idx), (idx, idx), event_mask_tensor


class SetCriterion:
    def __init__(self, config, matcher, na_coef=0.1, losses=("event", "role")):
        self.config = config
        self.matcher = matcher
        self.num_classes = config.event_type_classes
        self.losses = losses
        if config.event_type_weight:
            self.type_weight = jnp.asarray(config.event_type_weight, jnp.float32)
        else:
            self.type_weight = (
                jnp.ones(self.num_classes, jnp.float32).at[-1].set(na_coef))

    # forward
    def __call__(self, outputs, targets, event_mask_tensor, argument_mask_tensor):
        indices_tensor, last_matching_index, event_mask_tensor = self.matcher(
            outputs, targets, event_mask_tensor)

        tasks, all_role_ignored = self._event_and_role_tasks(
            outputs, targets, indices_tensor, last_matching_index,
            argument_mask_tensor)
        if self.config.use_context_consistency:
            tasks = tasks + [self._context_task(outputs, targets,
                                                last_matching_index)]

        sums = fused_weighted_ce_sums(tasks)      # ONE kernel launch for all CE heads

        event_type_loss = sums[0, 0] / sums[0, 1]
        role_den = jnp.where(sums[1, 1] == 0.0, 1.0, sums[1, 1])  # avoid 0/0 under mask
        role_loss = sums[1, 0] / role_den
        # matches the PyTorch reference: when EVERY role label is ignore_index,
        # BOTH role_loss and event_type_loss are forced to zero.
        role_loss = jnp.where(all_role_ignored, 0.0, role_loss)
        event_type_loss = jnp.where(all_role_ignored, 0.0, event_type_loss)
        losses = event_type_loss + role_loss
        if self.config.use_context_consistency:
            # matches torch F.cross_entropy(..., reduction='mean') semantics
            losses = losses + sums[2, 0] / sums[2, 1]
        return losses, event_mask_tensor, indices_tensor

    # ----- task builders (gathers / label masking stay in plain-JAX glue) -------
    def _event_and_role_tasks(self, outputs, targets, indices_tensor,
                              last_matching_index, argument_mask_tensor):
        pred_role = outputs["pred_role"]                       # [S, R, E]
        num_sets, num_roles, num_entities = pred_role.shape
        pred_event = outputs["pred_doc_event"]                 # [S, K]
        gold_event = jnp.asarray(targets["doc_event_label"], jnp.int32)
        gold_role = jnp.asarray(targets["role_label"], jnp.int32)
        if self.num_classes == 2:
            gold_event = jnp.zeros_like(gold_event)

        # TODO(synk): matched-row gathers are done in plain JAX; an in-kernel
        # scalar-prefetch (pl.Element) row gather would avoid this HBM round trip.
        sel_pred_role = pred_role[last_matching_index[0]]      # [M, R, E]
        sel_gold_role = gold_role[last_matching_index[1]]      # [M, R]
        ignore_index = -1
        if argument_mask_tensor is not None:
            sel_mask = argument_mask_tensor[last_matching_index[0]]
            sel_gold_role = jnp.where(sel_mask == 1, ignore_index, sel_gold_role)

        gold_event_label = jnp.full((pred_event.shape[0],), self.num_classes - 1,
                                    dtype=jnp.int32)
        gold_event_label = gold_event_label.at[indices_tensor[0]].set(
            gold_event[indices_tensor[1]])

        role_weight = (jnp.ones(num_entities, jnp.float32)
                       .at[-1].set(self.config.neg_field_loss_scaling))

        event_task = _ce_task(pred_event, gold_event_label, self.type_weight,
                              ignore_index=-100)
        role_task = _ce_task(sel_pred_role.reshape(-1, num_entities),
                             sel_gold_role.reshape(-1), role_weight,
                             ignore_index=ignore_index)
        all_role_ignored = jnp.all(sel_gold_role == ignore_index)
        return [event_task, role_task], all_role_ignored

    def _context_task(self, outputs, targets, last_matching_index):
        pred_context = outputs["pred_context"]                 # [S, T, Cctx]
        gold_context = jnp.asarray(targets["context_label"], jnp.int32)
        sel_pred = pred_context[last_matching_index[0]]        # [M, T, Cctx]
        sel_gold = gold_context[last_matching_index[1]]        # [M, T]
        m, t, cctx = sel_pred.shape
        return _ce_task(sel_pred.reshape(m * t, cctx), sel_gold.reshape(m * t),
                        jnp.ones((cctx,), jnp.float32), ignore_index=-100)


# ----------------------------------------------------------------------------
# Example run + pure-JAX reference check
# ----------------------------------------------------------------------------
if __name__ == "__main__":
    key = jax.random.PRNGKey(0)
    k1, k2, k3, k4, k5, k6 = jax.random.split(key, 6)

    num_sets, num_roles, num_entities = 8, 8, 16
    num_classes, num_gold, num_tokens, num_ctx_classes = 4, 3, 8, 4

    cfg = Config(event_type_classes=num_classes,
                 event_type_weight=None,
                 neg_field_loss_scaling=3.0,
                 use_context_consistency=True)

    outputs = {
        "pred_doc_event": jax.random.normal(k1, (num_sets, num_classes), jnp.float32),
        "pred_role": jax.random.normal(k2, (num_sets, num_roles, num_entities),
                                       jnp.float32),
        "pred_context": jax.random.normal(k3, (num_sets, num_tokens, num_ctx_classes),
                                          jnp.float32),
    }
    targets = {
        "doc_event_label": jax.random.randint(k4, (num_gold,), 0, num_classes - 1,
                                              jnp.int32),
        "role_label": jax.random.randint(k5, (num_gold, num_roles), 0, num_entities,
                                         jnp.int32),
        "context_label": jax.random.randint(k6, (num_gold, num_tokens), 0,
                                            num_ctx_classes, jnp.int32),
    }
    event_mask_tensor = jnp.ones((num_sets,), jnp.float32)
    argument_mask_tensor = jnp.zeros((num_sets, num_roles), jnp.int32).at[:, -1].set(1)

    criterion = SetCriterion(cfg, identity_matcher, na_coef=0.1)
    losses, event_mask_out, indices = criterion(
        outputs, targets, event_mask_tensor, argument_mask_tensor)
    losses = jax.block_until_ready(losses)
    jax.block_until_ready(event_mask_out)
    jax.block_until_ready(indices)

    # ---- pure-JAX reference (no Pallas) of the same forward pass ----
    def ref_ce(logits, labels, weight, ignore):
        logits = logits.astype(jnp.float32)
        n, c = logits.shape
        logp = jax.nn.log_softmax(logits, axis=-1)
        valid = (labels != ignore) & (labels >= 0) & (labels < c)
        lab = jnp.clip(labels, 0, c - 1)
        nll = -jnp.take_along_axis(logp, lab[:, None], axis=1)[:, 0]
        w = jnp.where(valid, weight[lab], 0.0)
        return jnp.sum(w * nll) / jnp.sum(w)

    idx = jnp.arange(num_gold, dtype=jnp.int32)
    gold_event_label = jnp.full((num_sets,), num_classes - 1, jnp.int32).at[idx].set(
        targets["doc_event_label"][idx])
    type_weight = jnp.ones(num_classes, jnp.float32).at[-1].set(0.1)
    ev_ref = ref_ce(outputs["pred_doc_event"], gold_event_label, type_weight, -100)
    sel_gold_role = jnp.where(argument_mask_tensor[idx] == 1, -1,
                              targets["role_label"][idx])
    role_weight = jnp.ones(num_entities, jnp.float32).at[-1].set(3.0)
    rl_ref = ref_ce(outputs["pred_role"][idx].reshape(-1, num_entities),
                    sel_gold_role.reshape(-1), role_weight, -1)
    cx_ref = ref_ce(outputs["pred_context"][idx].reshape(-1, num_ctx_classes),
                    targets["context_label"][idx].reshape(-1),
                    jnp.ones(num_ctx_classes, jnp.float32), -100)
    ref_losses = float(ev_ref + rl_ref + cx_ref)

    err = abs(float(losses) - ref_losses)
    assert err < 1e-3 * max(1.0, abs(ref_losses)), (float(losses), ref_losses)
    print("KERNEL_OK")
</pallas_src>

<mosaic_0001>
module attributes {stable_mosaic.version = 11 : i64} {
  func.func @_fused_ce_kernel(%arg0: i32, %arg1: memref<16x128xf32, #tpu.memory_space<vmem>>, %arg2: memref<2x128xi32, #tpu.memory_space<vmem>>, %arg3: memref<1x128xf32, #tpu.memory_space<vmem>>, %arg4: memref<8x128xf32, #tpu.memory_space<vmem>>) attributes {dimension_semantics = [#tpu.dimension_semantics<parallel>], iteration_bounds = array<i64: 1>, scalar_prefetch = 0 : i64, scratch_operands = 0 : i64, tpu.core_type = #tpu.core_type<tc>, window_params = [{transform_indices = @transform_0, window_bounds = array<i64: 16, 128>}, {transform_indices = @transform_1, window_bounds = array<i64: 2, 128>}, {transform_indices = @transform_2, window_bounds = array<i64: 1, 128>}, {transform_indices = @transform_3, window_bounds = array<i64: 8, 128>}]} {
    %c0 = arith.constant 0 : index
    %c0_0 = arith.constant 0 : index
    %0 = vector.load %arg1[%c0, %c0_0] : memref<16x128xf32, #tpu.memory_space<vmem>>, vector<16x128xf32>
    %c0_1 = arith.constant 0 : index
    %c0_2 = arith.constant 0 : index
    %1 = vector.load %arg2[%c0_1, %c0_2] : memref<2x128xi32, #tpu.memory_space<vmem>>, vector<1x128xi32>
    %c1 = arith.constant 1 : index
    %c0_3 = arith.constant 0 : index
    %2 = vector.load %arg2[%c1, %c0_3] : memref<2x128xi32, #tpu.memory_space<vmem>>, vector<1x128xi32>
    %c0_4 = arith.constant 0 : index
    %c0_5 = arith.constant 0 : index
    %3 = vector.load %arg3[%c0_4, %c0_5] : memref<1x128xf32, #tpu.memory_space<vmem>>, vector<1x128xf32>
    %4 = tpu.iota {dimensions = array<i32: 0>} : vector<16x128xi32>
    %c4_i32 = arith.constant 4 : i32
    %5 = vector.broadcast %c4_i32 : i32 to vector<1x128xi32>
    %c0_i32 = arith.constant 0 : i32
    %6 = vector.broadcast %c0_i32 : i32 to vector<1x128xi32>
    %7 = arith.cmpi eq, %2, %6 : vector<1x128xi32>
    %c4_i32_6 = arith.constant 4 : i32
    %8 = vector.broadcast %c4_i32_6 : i32 to vector<1x128xi32>
    %9 = arith.select %7, %8, %5 : vector<1x128xi1>, vector<1x128xi32>
    %c1_i32 = arith.constant 1 : i32
    %10 = vector.broadcast %c1_i32 : i32 to vector<1x128xi32>
    %11 = arith.cmpi eq, %2, %10 : vector<1x128xi32>
    %c16_i32 = arith.constant 16 : i32
    %12 = vector.broadcast %c16_i32 : i32 to vector<1x128xi32>
    %13 = arith.select %11, %12, %9 : vector<1x128xi1>, vector<1x128xi32>
    %14 = vector.broadcast %13 : vector<1x128xi32> to vector<16x128xi32>
    %15 = arith.cmpi slt, %4, %14 : vector<16x128xi32>
    %cst = arith.constant -1.000000e+30 : f32
    %16 = vector.broadcast %cst : f32 to vector<16x128xf32>
    %17 = arith.select %15, %0, %16 : vector<16x128xi1>, vector<16x128xf32>
    %cst_7 = arith.constant dense<0xFF800000> : vector<128xf32>
    %18 = vector.multi_reduction <maximumf>, %17, %cst_7 [0] : vector<16x128xf32> to vector<128xf32>
    %19 = vector.shape_cast %18 : vector<128xf32> to vector<1x128xf32>
    %20 = vector.broadcast %19 : vector<1x128xf32> to vector<16x128xf32>
    %21 = arith.subf %17, %20 : vector<16x128xf32>
    %22 = math.exp %21 : vector<16x128xf32>
    %cst_8 = arith.constant dense<0.000000e+00> : vector<128xf32>
    %23 = vector.multi_reduction <add>, %22, %cst_8 [0] : vector<16x128xf32> to vector<128xf32>
    %24 = vector.shape_cast %23 : vector<128xf32> to vector<1x128xf32>
    %25 = math.log %24 : vector<1x128xf32>
    %26 = arith.addf %19, %25 : vector<1x128xf32>
    %27 = vector.broadcast %1 : vector<1x128xi32> to vector<16x128xi32>
    %28 = arith.cmpi eq, %4, %27 : vector<16x128xi32>
    %cst_9 = arith.constant 0.000000e+00 : f32
    %29 = vector.broadcast %cst_9 : f32 to vector<16x128xf32>
    %30 = arith.select %28, %17, %29 : vector<16x128xi1>, vector<16x128xf32>
    %cst_10 = arith.constant dense<0.000000e+00> : vector<128xf32>
    %31 = vector.multi_reduction <add>, %30, %cst_10 [0] : vector<16x128xf32> to vector<128xf32>
    %32 = vector.shape_cast %31 : vector<128xf32> to vector<1x128xf32>
    %cst_11 = arith.constant 0.000000e+00 : f32
    %33 = vector.broadcast %cst_11 : f32 to vector<1x128xf32>
    %34 = arith.cmpf ogt, %3, %33 : vector<1x128xf32>
    %35 = arith.subf %26, %32 : vector<1x128xf32>
    %36 = arith.mulf %3, %35 : vector<1x128xf32>
    %cst_12 = arith.constant 0.000000e+00 : f32
    %37 = vector.broadcast %cst_12 : f32 to vector<1x128xf32>
    %38 = arith.select %34, %36, %37 : vector<1x128xi1>, vector<1x128xf32>
    %c0_i32_13 = arith.constant 0 : i32
    %39 = vector.broadcast %c0_i32_13 : i32 to vector<1x128xi32>
    %40 = arith.cmpi eq, %2, %39 : vector<1x128xi32>
    %cst_14 = arith.constant 0.000000e+00 : f32
    %41 = vector.broadcast %cst_14 : f32 to vector<1x128xf32>
    %42 = arith.select %40, %38, %41 : vector<1x128xi1>, vector<1x128xf32>
    %cst_15 = arith.constant 0.000000e+00 : f32
    %43 = vector.broadcast %cst_15 : f32 to vector<1x128xf32>
    %44 = arith.select %40, %3, %43 : vector<1x128xi1>, vector<1x128xf32>
    %c1_i32_16 = arith.constant 1 : i32
    %45 = vector.broadcast %c1_i32_16 : i32 to vector<1x128xi32>
    %46 = arith.cmpi eq, %2, %45 : vector<1x128xi32>
    %cst_17 = arith.constant 0.000000e+00 : f32
    %47 = vector.broadcast %cst_17 : f32 to vector<1x128xf32>
    %48 = arith.select %46, %38, %47 : vector<1x128xi1>, vector<1x128xf32>
    %cst_18 = arith.constant 0.000000e+00 : f32
    %49 = vector.broadcast %cst_18 : f32 to vector<1x128xf32>
    %50 = arith.select %46, %3, %49 : vector<1x128xi1>, vector<1x128xf32>
    %c2_i32 = arith.constant 2 : i32
    %51 = vector.broadcast %c2_i32 : i32 to vector<1x128xi32>
    %52 = arith.cmpi eq, %2, %51 : vector<1x128xi32>
    %cst_19 = arith.constant 0.000000e+00 : f32
    %53 = vector.broadcast %cst_19 : f32 to vector<1x128xf32>
    %54 = arith.select %52, %38, %53 : vector<1x128xi1>, vector<1x128xf32>
    %cst_20 = arith.constant 0.000000e+00 : f32
    %55 = vector.broadcast %cst_20 : f32 to vector<1x128xf32>
    %56 = arith.select %52, %3, %55 : vector<1x128xi1>, vector<1x128xf32>
    %cst_21 = arith.constant 0.000000e+00 : f32
    %57 = vector.broadcast %cst_21 : f32 to vector<1x128xf32>
    %58 = tpu.concatenate %42, %44, %48, %50, %54, %56, %57, %57 in 0 : vector<1x128xf32>, vector<1x128xf32>, vector<1x128xf32>, vector<1x128xf32>, vector<1x128xf32>, vector<1x128xf32>, vector<1x128xf32>, vector<1x128xf32> -> vector<8x128xf32>
    %c0_22 = arith.constant 0 : index
    %c0_23 = arith.constant 0 : index
    %59 = vector.load %arg4[%c0_22, %c0_23] : memref<8x128xf32, #tpu.memory_space<vmem>>, vector<8x128xf32>
    tpu.vector_store %arg4[%c0_22, %c0_23], %58 {strides = array<i32>} : memref<8x128xf32, #tpu.memory_space<vmem>>, vector<8x128xf32>,
    return
  }
  func.func @transform_0(%arg0: i32) -> (i32, i32) {
    %c0_i32 = arith.constant 0 : i32
    %c0_i32_0 = arith.constant 0 : i32
    return %c0_i32, %arg0 : i32, i32
  }
  func.func @transform_1(%arg0: i32) -> (i32, i32) {
    %c0_i32 = arith.constant 0 : i32
    %c0_i32_0 = arith.constant 0 : i32
    return %c0_i32, %arg0 : i32, i32
  }
  func.func @transform_2(%arg0: i32) -> (i32, i32) {
    %c0_i32 = arith.constant 0 : i32
    %c0_i32_0 = arith.constant 0 : i32
    return %c0_i32, %arg0 : i32, i32
  }
  func.func @transform_3(%arg0: i32) -> (i32, i32) {
    %c0_i32 = arith.constant 0 : i32
    %c0_i32_0 = arith.constant 0 : i32
    return %arg0, %c0_i32 : i32, i32
  }
}

</mosaic_0001>

<bundles_post_ra>
// kernel: tpu_custom_call.1
= control target key start
LH: loop header
LB: loop body
LE: loop exit
PB: predicated region body
PF: predicated region fallthrough
CT: control target
= control target key end

     0   :  { %8 = vsyncpa [#allocation3], 0  ;;  %s271_s0 = inlined_call_operand.hbm [shape: f32[16,128], index: 0, kind: input, shape index: {}]   ;;  %s272_s1 = inlined_call_operand.vmem [shape: s32[2,128], index: 1, kind: input, shape index: {}]   ;;  %s273_s2 = inlined_call_operand.vmem [shape: f32[1,128], index: 2, kind: input, shape index: {}]   ;;  %s274_s3 = inlined_call_operand.hbm [shape: f32[8,128], index: 3, kind: output, shape index: {}]  }
   0x1   :  { %9 = vsyncpa [#allocation4], 0  ;;  %s202_s12 = smov [#allocation2]   ;;  %s154_s16 = scalar_lea.hbm %s271_s0, 256 }
   0x2   :  { %s15_s13 = sshll.u32 %s202_s12, 4  ;;  %p155_p0 = scmp.ne.s32.totalorder %s271_s0, %s154_s16  ;;  %s16_s13 = int_to_ptr.vmem [resolvable:$true] %s15_s13 }
   0x3   :  { %p158_p1 = scmp.lt.u32.totalorder %s154_s16, %s271_s0 }
   0x5   :  { %p160_p2 = pnand %p158_p1, %p155_p0 }
   0x7   :  { %163 = shalt.err (!%p160_p2)
}
   0x8   :  { %s164_s21 = scalar_lea.vmem %s16_s13, 256  ;;  %p169_p4 = scmp.lt.s32.totalorder %s16_s13, %s16_s13 }
   0x9   :  { %p165_p3 = scmp.ne.s32.totalorder %s16_s13, %s164_s21  ;;  %p170_p5 = scmp.lt.s32.totalorder %s164_s21, %s164_s21 }
   0xb   :  { %p171_p6 = por %p170_p5, %p169_p4 }
   0xd   :  { %p172_p7 = pnand %p171_p6, %p165_p3 }
   0xf   :  { %175 = shalt.err (!%p172_p7)
}
  0x10   :  { %s203_s22 = smov 128   ;;  %s204_s23 = smov 8  }
  0x11   :  { %21 = dma.hbm_to_vmem [thread:$0]  %s271_s0, 256, %s16_s13, [#allocation3], %s203_s22, %s203_s22, %s204_s23  }
  0x12   :  { %198 = dma.done.wait [#allocation3], 256  }
  0x13   :  { %199 = vsyncadd [#allocation3], 4294967040  ;;  %v34_v0 = vlaneseq  ;;  %v242_v3 = vld [vmem:[%s272_s1 + $0x1] sm:$0x1]  ;;  %v205_v5 = vmov 4   ;;  %v30_v8 = vld [vmem:[#allocation2 + $0x8] sm:$0xff] }
  0x14   :  { %vm37_vm0 = vcmp.eq.s32.totalorder %v242_v3, 1  ;;  %v29_v7 = vld [vmem:[#allocation2] sm:$0xff]  ;;  %vm89_vm5 = vcmp.eq.s32.totalorder %v242_v3, 0  ;;  %vm94_vm7 = vcmp.eq.s32.totalorder %v242_v3, 2  ;;  %vm112_vm8 = vcmask 1040384  }
  0x15   :  { %v35_v1 = vshrl.u32 %v34_v0, 7  ;;  %v38_v6 = vsel %vm37_vm0, 16, %v205_v5  ;;  %v142_v23 = vld [vmem:[%s272_s1] ss:$0 sm:$0xff]  ;;  %vm114_vm9 = vcmask 1041408   ;;  %vm116_vm10 = vcmask 1042432  }
  0x16   :  { %v33_v44 = vld [vmem:[%s273_s2] sm:$0x1]  ;;  %vm118_vm11 = vcmask 1043456   ;;  %vm120_vm12 = vcmask 1044480   ;;  %vm122_vm13 = vcmask 1045504   ;;  %s206_s2 = smov [#allocation5]  }
  0x17   :  { %v41_v2 = vsub.s32 0, %v35_v1  ;;  %v36_v4 = vadd.s32 8, %v35_v1  ;;  %vm74_vm3 = vcmp.eq.s32.totalorder %v35_v1, %v142_v23  ;;  %v91_v46 = vsel %vm89_vm5, %v33_v44, 0.0  ;;  %s133_s30 = sshll.u32 %s206_s2, 4  ;;  %s134_s30 = int_to_ptr.vmem [resolvable:$true] %s133_s30 }
  0x18   :  { %vm85_vm6 = vcmp.gt.f32.partialorder %v33_v44, 0.0  ;;  %v93_v49 = vsel %vm37_vm0, %v33_v44, 0.0  ;;  %v98_v50 = vrot.slane %v91_v46, 7  ;;  %v96_v52 = vsel %vm94_vm7, %v33_v44, 0.0  ;;  %s176_s4 = scalar_lea.vmem %s134_s30, 128  ;;  %p181_p9 = scmp.lt.s32.totalorder %s134_s30, %s134_s30 }
  0x19   :  { %v42_v9 = vrot.slane %v38_v6, %v41_v2  ;;  %vm75_vm4 = vcmp.eq.s32.totalorder %v36_v4, %v142_v23  ;;  %v104_v56 = vrot.slane %v93_v49, 5  ;;  %v110_v60 = vrot.slane %v96_v52, 3  ;;  %p177_p8 = scmp.ne.s32.totalorder %s134_s30, %s176_s4  ;;  %p182_p10 = scmp.lt.s32.totalorder %s176_s4, %s176_s4 }
  0x1a   :  { %vm124_vm14 = vcmask 1046528  }
  0x1b   :  { %vm43_vm1 = vcmp.lt.s32.totalorder %v35_v1, %v42_v9  ;;  %vm44_vm2 = vcmp.lt.s32.totalorder %v36_v4, %v42_v9  ;;  %p183_p11 = por %p182_p10, %p181_p9 }
  0x1c   :  { %v45_v10 = vsel %vm43_vm1, %v29_v7, -1e+30  ;;  %v46_v11 = vsel %vm44_vm2, %v30_v8, -1e+30 }
  0x1d   :  { %v47_v12 = vmax.f32 %v45_v10, %v46_v11  ;;  %v76_v25 = vsel %vm74_vm3, %v45_v10, 0.0  ;;  %v77_v26 = vsel %vm75_vm4, %v46_v11, 0.0  ;;  %p184_p12 = pnand %p183_p11, %p177_p8 }
  0x1e   :  { %v78_v29 = vadd.f32 %v77_v26, %v76_v25 }
  0x1f   :  { %v48_v13 = vrot.slane %v47_v12, 4 }
  0x20   :  { %v79_v32 = vrot.slane %v78_v29, 4 }
  0x21   :  { %v49_v14 = vmax.f32 %v47_v12, %v48_v13 }
  0x22   :  { %v80_v35 = vadd.f32 %v79_v32, %v78_v29 }
  0x23   :  { %v50_v15 = vrot.slane %v49_v14, 2 }
  0x24   :  { %v81_v38 = vrot.slane %v80_v35, 2 }
  0x25   :  { %v51_v16 = vmax.f32 %v49_v14, %v50_v15 }
  0x26   :  { %v82_v39 = vadd.f32 %v81_v38, %v80_v35 }
  0x27   :  { %v52_v17 = vrot.slane %v51_v16, 1 }
  0x28   :  { %v83_v40 = vrot.slane %v82_v39, 1 }
  0x29   :  { %v53_v18 = vmax.f32 %v51_v16, %v52_v17 }
  0x2a   :  { %v84_v43 = vadd.f32 %v83_v40, %v82_v39 }
  0x2b   :  { %v54_v19 = vsub.f32 %v45_v10, %v53_v18  ;;  %v55_v20 = vsub.f32 %v46_v11, %v53_v18 }
  0x2d   :  { %v56_v21 = vmul.f32 1.442695, %v54_v19  ;;  %v58_v22 = vmul.f32 1.442695, %v55_v20 }
  0x2f   :  { %148 = vpow2.f32 %v56_v21 }
  0x30   :  { %150 = vpow2.f32 %v58_v22 }
  0x39   :  { %v149_v24 = vpop.eup %148 }
  0x3a   :  { %v151_v27 = vpop.eup %150 }
  0x3b   :  { %v60_v28 = vadd.f32 %v151_v27, %v149_v24 }
  0x3d   :  { %v61_v30 = vrot.slane %v60_v28, 4 }
  0x3f   :  { %v62_v31 = vadd.f32 %v61_v30, %v60_v28 }
  0x41   :  { %v63_v33 = vrot.slane %v62_v31, 2 }
  0x43   :  { %v64_v34 = vadd.f32 %v63_v33, %v62_v31 }
  0x45   :  { %v65_v36 = vrot.slane %v64_v34, 1 }
  0x47   :  { %v66_v37 = vadd.f32 %v65_v36, %v64_v34 }
  0x49   :  { %152 = vlog2.f32 %v66_v37 }
  0x53   :  { %v153_v41 = vpop.eup %152 }
  0x54   :  { %v68_v42 = vmul.f32 0.6931472, %v153_v41 }
  0x56   :  { %v69_v45 = vadd.f32 %v68_v42, %v53_v18 }
  0x58   :  { %v86_v47 = vsub.f32 %v69_v45, %v84_v43 }
  0x5a   :  { %v87_v48 = vmul.f32 %v86_v47, %v33_v44 }
  0x5c   :  { %v88_v51 = vsel %vm85_vm6, %v87_v48, 0.0 }
  0x5d   :  { %v90_v53 = vsel %vm89_vm5, %v88_v51, 0.0  ;;  %v92_v54 = vsel %vm37_vm0, %v88_v51, 0.0  ;;  %v95_v55 = vsel %vm94_vm7, %v88_v51, 0.0 }
  0x5e   :  { %v101_v57 = vrot.slane %v92_v54, 6  ;;  %v107_v58 = vrot.slane %v95_v55, 4  ;;  %v113_v59 = vsel %vm112_vm8, %v90_v53, %v98_v50 }
  0x60   :  { %v115_v61 = vsel %vm114_vm9, %v113_v59, %v101_v57 }
  0x61   :  { %v117_v62 = vsel %vm116_vm10, %v115_v61, %v104_v56 }
  0x62   :  { %v119_v63 = vsel %vm118_vm11, %v117_v62, %v107_v58 }
  0x63   :  { %v121_v0 = vsel %vm120_vm12, %v119_v63, %v110_v60 }
  0x64   :  { %v123_v1 = vsel %vm122_vm13, %v121_v0, 0.0 }
  0x65   :  { %v125_v2 = vsel %vm124_vm14, %v123_v1, 0.0 }
  0x66   :  { %126 = vst [vmem:[#allocation5] sm:$0xff] %v125_v2 }
  0x67   :  { %187 = shalt.err (!%p184_p12)
}
  0x68   :  { %s188_s7 = scalar_lea.hbm %s274_s3, 128 }
  0x69   :  { %p189_p13 = scmp.ne.s32.totalorder %s274_s3, %s188_s7  ;;  %p192_p0 = scmp.lt.u32.totalorder %s188_s7, %s274_s3 }
  0x6b   :  { %p194_p1 = pnand %p192_p0, %p189_p13 }
  0x6d   :  { %197 = shalt.err (!%p194_p1)
}
  0x6e   :  { %136 = dma.vmem_to_hbm [thread:$0]  %s134_s30, 128, %s274_s3, [#allocation4]  }
  0x6f   :  { %200 = dma.done.wait [#allocation4], 128  }
  0x70   :  { %201 = vsyncadd [#allocation4], 4294967168 }
  0x71   :  { %140 = vsyncpa [#allocation3], 1 }
  0x72   :  { %141 = vsyncpa [#allocation4], 1 }

</bundles_post_ra>
